<compile_context>
chip_gen: v7x
topology: tpu7x:2x2x1
jax: 0.10.0
libtpu: 0.0.40
codegen_flags: <defaults>
</compile_context>

<pallas_src>
import math

import jax
import jax.numpy as jnp
from jax.experimental import pallas as pl
from jax.experimental.pallas import tpu as pltpu


def _build_pe(d_model: int, max_len: int = 5000, dtype=jnp.float32) -> jnp.ndarray:
    """Sinusoidal positional-encoding buffer, shape (max_len, d_model).

    Matches the PyTorch module for even d_model; also handles odd d_model
    (the cos half is truncated to floor(d/2) columns instead of erroring).
    Build it once, in the activation dtype, at module-init time.
    """
    position = jnp.arange(0, max_len, dtype=jnp.float32)[:, None]           # (max_len, 1)
    div_term = jnp.exp(
        jnp.arange(0, d_model, 2, dtype=jnp.float32) * (-math.log(10000.0) / d_model)
    )                                                                        # (ceil(d/2),)
    angles = position * div_term                                             # (max_len, ceil(d/2))
    pe = jnp.zeros((max_len, d_model), dtype=jnp.float32)
    pe = pe.at[:, 0::2].set(jnp.sin(angles))
    pe = pe.at[:, 1::2].set(jnp.cos(angles)[:, : d_model // 2])
    return pe.astype(dtype)


def _pos_enc_kernel(x_ref, pe_ref, o_ref):
    # x_ref / o_ref: (ts, D) (squeezed batch) or (B, ts, D) (folded batch);
    # pe_ref: (ts, D).  Trailing-dim broadcasting makes one body cover both.
    # pe is already in x's dtype, so this is a straight 2-vld/1-vadd/1-vst stream.
    o_ref[...] = (x_ref[...] + pe_ref[...]).astype(o_ref.dtype)


_VMEM_LIMIT_BYTES = 48 * 1024 * 1024  # safe on v5e/v6e (128 MiB phys) and v7x (64 MiB/TC)


def _pos_enc_call(x, pe, target_block_bytes, vmem_limit_bytes, in_place):
    """x: (B, S, D); pe: (P, D) with P >= S, same dtype as x."""
    B, S, D = x.shape
    P = pe.shape[0]
    itemsize = jnp.dtype(x.dtype).itemsize
    pack = max(8, 32 // itemsize)  # sublane pack: 8 f32 / 16 bf16 / 32 int8

    # ---- pick the sequence tile and whether to fold batch into the block ----
    whole_bytes = B * S * D * itemsize
    rows_folded = (target_block_bytes // max(1, B * D * itemsize)) // pack * pack
    if whole_bytes <= target_block_bytes:
        fold_batch, ts = True, S                       # whole tensor in one block
    elif rows_folded >= pack:
        fold_batch, ts = True, min(S, rows_folded)     # (B, ts, D) blocks
    else:
        fold_batch = False                             # batch as inner grid axis
        rows = (target_block_bytes // max(1, D * itemsize)) // pack * pack
        ts = min(S, max(pack, rows))

    # (8,128) rule: a (ts, D) pe block needs ts % 8 == 0 OR full-extent rows.
    # Only the "whole-S block with S not a multiple of 8" case needs a slice.
    if ts == S and (S % 8 != 0) and P != S:
        pe = pe[:S]
        P = S

    s_tiles = pl.cdiv(S, ts)

    if fold_batch:
        # Fewer grid steps (B folded); pe fetched once per S-tile.
        grid = (s_tiles,)
        x_spec = pl.BlockSpec((B, ts, D), lambda s: (0, s, 0))
        pe_spec = pl.BlockSpec((ts, D), lambda s: (s, 0))
        o_spec = pl.BlockSpec((B, ts, D), lambda s: (0, s, 0))
        semantics = ("parallel",)
    else:
        # Batch innermost: pe block index constant across it -> DMA'd once per
        # S-tile and reused for every batch row.  Leading batch dim is squeezed
        # so kernel refs are plain (ts, D) — no broadcast, identical layouts.
        grid = (s_tiles, B)
        x_spec = pl.BlockSpec((None, ts, D), lambda s, b: (b, s, 0))
        pe_spec = pl.BlockSpec((ts, D), lambda s, b: (s, 0))
        o_spec = pl.BlockSpec((None, ts, D), lambda s, b: (b, s, 0))
        semantics = ("parallel", "parallel")

    return pl.pallas_call(
        _pos_enc_kernel,
        out_shape=jax.ShapeDtypeStruct((B, S, D), x.dtype),
        grid=grid,
        in_specs=[x_spec, pe_spec],
        out_specs=o_spec,
        # In-place add on x's HBM buffer only when the caller donates x.
        input_output_aliases={0: 0} if in_place else {},
        compiler_params=pltpu.CompilerParams(
            dimension_semantics=semantics,
            vmem_limit_bytes=vmem_limit_bytes,
        ),
    )(x, pe)


def positional_encoding(
    x: jnp.ndarray,
    pe: jnp.ndarray,
    *,
    target_block_bytes: int = 4 << 20,
    vmem_limit_bytes: int = _VMEM_LIMIT_BYTES,
    in_place: bool = False,
) -> jnp.ndarray:
    """x: (B, S, D); pe: (max_len, D).  Returns x + pe[:S] (broadcast over batch)."""
    B, S, D = x.shape
    assert pe.ndim == 2 and pe.shape[1] == D and pe.shape[0] >= S
    if pe.dtype != x.dtype:
        # Fallback only: ideally pe is built in the activation dtype at init
        # (see _build_pe) so no per-call cast traffic is ever emitted.
        pe = pe.astype(x.dtype)

    # Lane-densify narrow feature dims: fold k = 128 // D consecutive sequence
    # rows into the lane axis so output stores are unmasked full-lane vst.
    if D < 128 and 128 % D == 0 and S % (128 // D) == 0:
        k = 128 // D
        out = _pos_enc_call(
            x.reshape(B, S // k, k * D),
            pe[:S].reshape(S // k, k * D),
            target_block_bytes, vmem_limit_bytes, in_place,
        )
        return out.reshape(B, S, D)

    return _pos_enc_call(x, pe, target_block_bytes, vmem_limit_bytes, in_place)


if __name__ == "__main__":
    key = jax.random.PRNGKey(0)
    max_len = 64

    # 1) Primary check: lane-dense D=128 — whole tensor in one (B, S, D) block
    #    (batch-folded path, grid = (1,)).
    B, S, D = 2, 16, 128
    x = jax.random.normal(key, (B, S, D), dtype=jnp.float32)
    pe = _build_pe(D, max_len, dtype=jnp.float32)   # built once, activation dtype
    ref = x + pe[None, :S, :]
    out = jax.block_until_ready(positional_encoding(x, pe))
    assert out.shape == (B, S, D) and out.dtype == jnp.float32
    assert jnp.allclose(out, ref, atol=1e-6), "mismatch vs reference (D=128)"

    # 2) Narrow D (< 128): lane-densified wrapper path ((B,S,D) -> (B,S/k,k*D)).
    B2, S2, D2 = 2, 8, 32
    x2 = jax.random.normal(jax.random.PRNGKey(1), (B2, S2, D2), dtype=jnp.float32)
    pe2 = _build_pe(D2, max_len)
    ref2 = x2 + pe2[None, :S2, :]
    out2 = jax.block_until_ready(positional_encoding(x2, pe2))
    assert jnp.allclose(out2, ref2, atol=1e-6), "mismatch vs reference (D=32)"

    # 3) Force the tiled, squeezed-batch path (grid = (S_tiles, B)) with an
    #    uneven S (partial last block) by shrinking the per-block byte budget.
    B3, S3, D3 = 2, 20, 128
    x3 = jax.random.normal(jax.random.PRNGKey(2), (B3, S3, D3), dtype=jnp.float32)
    pe3 = _build_pe(D3, max_len)
    ref3 = x3 + pe3[None, :S3, :]
    out3 = jax.block_until_ready(
        positional_encoding(x3, pe3, target_block_bytes=4 * 1024)
    )
    assert jnp.allclose(out3, ref3, atol=1e-6), "mismatch vs reference (tiled path)"

    print("KERNEL_OK")
</pallas_src>

<mosaic_0001>
module attributes {stable_mosaic.version = 11 : i64} {
  func.func @_pos_enc_kernel(%arg0: i32, %arg1: memref<2x16x128xf32, #tpu.memory_space<vmem>>, %arg2: memref<16x128xf32, #tpu.memory_space<vmem>>, %arg3: memref<2x16x128xf32, #tpu.memory_space<vmem>>) attributes {dimension_semantics = [#tpu.dimension_semantics<parallel>], iteration_bounds = array<i64: 1>, scalar_prefetch = 0 : i64, scratch_operands = 0 : i64, tpu.core_type = #tpu.core_type<tc>, window_params = [{transform_indices = @transform_0, window_bounds = array<i64: 2, 16, 128>}, {transform_indices = @transform_1, window_bounds = array<i64: 16, 128>}, {transform_indices = @transform_2, window_bounds = array<i64: 2, 16, 128>}]} {
    %c0 = arith.constant 0 : index
    %c0_0 = arith.constant 0 : index
    %c0_1 = arith.constant 0 : index
    %0 = vector.load %arg1[%c0, %c0_0, %c0_1] : memref<2x16x128xf32, #tpu.memory_space<vmem>>, vector<2x16x128xf32>
    %c0_2 = arith.constant 0 : index
    %c0_3 = arith.constant 0 : index
    %1 = vector.load %arg2[%c0_2, %c0_3] : memref<16x128xf32, #tpu.memory_space<vmem>>, vector<16x128xf32>
    %2 = vector.shape_cast %1 : vector<16x128xf32> to vector<1x16x128xf32>
    %3 = vector.broadcast %2 : vector<1x16x128xf32> to vector<2x16x128xf32>
    %4 = arith.addf %0, %3 : vector<2x16x128xf32>
    %c0_4 = arith.constant 0 : index
    %c0_5 = arith.constant 0 : index
    %c0_6 = arith.constant 0 : index
    %5 = vector.load %arg3[%c0_4, %c0_5, %c0_6] : memref<2x16x128xf32, #tpu.memory_space<vmem>>, vector<2x16x128xf32>
    tpu.vector_store %arg3[%c0_4, %c0_5, %c0_6], %4 {strides = array<i32>} : memref<2x16x128xf32, #tpu.memory_space<vmem>>, vector<2x16x128xf32>,
    return
  }
  func.func @transform_0(%arg0: i32) -> (i32, i32, i32) {
    %c0_i32 = arith.constant 0 : i32
    %c0_i32_0 = arith.constant 0 : i32
    %c0_i32_1 = arith.constant 0 : i32
    return %c0_i32, %arg0, %c0_i32_0 : i32, i32, i32
  }
  func.func @transform_1(%arg0: i32) -> (i32, i32) {
    %c0_i32 = arith.constant 0 : i32
    %c0_i32_0 = arith.constant 0 : i32
    return %arg0, %c0_i32 : i32, i32
  }
  func.func @transform_2(%arg0: i32) -> (i32, i32, i32) {
    %c0_i32 = arith.constant 0 : i32
    %c0_i32_0 = arith.constant 0 : i32
    %c0_i32_1 = arith.constant 0 : i32
    return %c0_i32, %arg0, %c0_i32_0 : i32, i32, i32
  }
}

</mosaic_0001>

<bundles_post_ra>
// kernel: tpu_custom_call.1
= control target key start
LH: loop header
LB: loop body
LE: loop exit
PB: predicated region body
PF: predicated region fallthrough
CT: control target
= control target key end

     0   :  { %7 = vsyncpa [#allocation3], 0  ;;  %s217_s0 = inlined_call_operand.hbm [shape: f32[2,16,128], index: 0, kind: input, shape index: {}]   ;;  %s218_s1 = inlined_call_operand.hbm [shape: f32[64,128], index: 1, kind: input, shape index: {}]   ;;  %s219_s2 = inlined_call_operand.hbm [shape: f32[2,16,128], index: 2, kind: output, shape index: {}]  }
   0x1   :  { %8 = vsyncpa [#allocation6], 0 }
   0x2   :  { %9 = vsyncpa [#allocation4], 0  ;;  %s149_s9 = smov [#allocation2]   ;;  %s77_s13 = scalar_lea.hbm %s217_s0, 512 }
   0x3   :  { %s15_s10 = sshll.u32 %s149_s9, 4  ;;  %p78_p0 = scmp.ne.s32.totalorder %s217_s0, %s77_s13  ;;  %s16_s10 = int_to_ptr.vmem [resolvable:$true] %s15_s10 }
   0x4   :  { %p81_p1 = scmp.lt.u32.totalorder %s77_s13, %s217_s0 }
   0x6   :  { %p83_p2 = pnand %p81_p1, %p78_p0 }
   0x8   :  { %86 = shalt.err (!%p83_p2)
}
   0x9   :  { %s87_s18 = scalar_lea.vmem %s16_s10, 512  ;;  %p92_p4 = scmp.lt.s32.totalorder %s16_s10, %s16_s10 }
   0xa   :  { %p88_p3 = scmp.ne.s32.totalorder %s16_s10, %s87_s18  ;;  %p93_p5 = scmp.lt.s32.totalorder %s87_s18, %s87_s18 }
   0xc   :  { %p94_p6 = por %p93_p5, %p92_p4 }
   0xe   :  { %p95_p7 = pnand %p94_p6, %p88_p3 }
  0x10   :  { %98 = shalt.err (!%p95_p7)
}
  0x11   :  { %s150_s19 = smov 128   ;;  %s151_s20 = smov 8  }
  0x12   :  { %21 = dma.hbm_to_vmem [thread:$0]  %s217_s0, 512, %s16_s10, [#allocation3], %s150_s19, %s150_s19, %s151_s20  }
  0x13   :  { %s152_s23 = smov [#allocation5]   ;;  %s99_s27 = scalar_lea.hbm %s218_s1, 256 }
  0x14   :  { %s27_s24 = sshll.u32 %s152_s23, 4  ;;  %p100_p8 = scmp.ne.s32.totalorder %s218_s1, %s99_s27  ;;  %s28_s24 = int_to_ptr.vmem [resolvable:$true] %s27_s24 }
  0x15   :  { %s101_s4 = scalar_lea.hbm %s218_s1, 1024  ;;  %p103_p10 = scmp.lt.u32.totalorder %s99_s27, %s218_s1 }
  0x16   :  { %p102_p9 = scmp.lt.u32.totalorder %s101_s4, %s99_s27 }
  0x18   :  { %p104_p11 = por %p103_p10, %p102_p9 }
  0x1a   :  { %p105_p12 = pnand %p104_p11, %p100_p8 }
  0x1c   :  { %108 = shalt.err (!%p105_p12)
}
  0x1d   :  { %s109_s0 = scalar_lea.vmem %s28_s24, 256  ;;  %p114_p0 = scmp.lt.s32.totalorder %s28_s24, %s28_s24 }
  0x1e   :  { %p110_p13 = scmp.ne.s32.totalorder %s28_s24, %s109_s0  ;;  %p115_p1 = scmp.lt.s32.totalorder %s109_s0, %s109_s0 }
  0x20   :  { %p116_p2 = por %p115_p1, %p114_p0 }
  0x22   :  { %p117_p3 = pnand %p116_p2, %p110_p13 }
  0x24   :  { %120 = shalt.err (!%p117_p3)
}
  0x25   :  { %33 = dma.hbm_to_vmem [thread:$0]  %s218_s1, 256, %s28_s24, [#allocation6], %s150_s19, %s150_s19, %s151_s20  }
  0x26   :  { %143 = dma.done.wait [#allocation3], 512  }
  0x27   :  { %144 = vsyncadd [#allocation3], 4294966784 }
  0x28   :  { %145 = dma.done.wait [#allocation6], 256  }
  0x29   :  { %146 = vsyncadd [#allocation6], 4294967040  ;;  %s153_s9 = smov [#allocation7]   ;;  %v40_v0 = vld [vmem:[#allocation2] sm:$0xff]  ;;  %v41_v2 = vld [vmem:[#allocation2 + $0x8] sm:$0xff] }
  0x2a   :  { %s59_s10 = sshll.u32 %s153_s9, 4  ;;  %v44_v1 = vld [vmem:[#allocation5] sm:$0xff]  ;;  %v45_v4 = vld [vmem:[#allocation5 + $0x8] sm:$0xff]  ;;  %v42_v5 = vld [vmem:[#allocation2 + $0x10] sm:$0xff]  ;;  %s60_s10 = int_to_ptr.vmem [resolvable:$true] %s59_s10 }
  0x2b   :  { %v46_v3 = vadd.f32 %v44_v1, %v40_v0  ;;  %v43_v6 = vld [vmem:[#allocation2 + $0x18] sm:$0xff]  ;;  %v47_v7 = vadd.f32 %v45_v4, %v41_v2  ;;  %v48_v8 = vadd.f32 %v44_v1, %v42_v5  ;;  %s121_s1 = scalar_lea.vmem %s60_s10, 512  ;;  %p126_p5 = scmp.lt.s32.totalorder %s60_s10, %s60_s10 }
  0x2c   :  { %v49_v9 = vadd.f32 %v45_v4, %v43_v6  ;;  %p122_p4 = scmp.ne.s32.totalorder %s60_s10, %s121_s1  ;;  %p127_p6 = scmp.lt.s32.totalorder %s121_s1, %s121_s1 }
  0x2d   :  { %50 = vst [vmem:[#allocation7] sm:$0xff] %v46_v3  ;;  %51 = vst [vmem:[#allocation7 + $0x8] sm:$0xff] %v47_v7 }
  0x2e   :  { %52 = vst [vmem:[#allocation7 + $0x10] sm:$0xff] %v48_v8  ;;  %53 = vst [vmem:[#allocation7 + $0x18] sm:$0xff] %v49_v9  ;;  %p128_p7 = por %p127_p6, %p126_p5 }
  0x30   :  { %p129_p8 = pnand %p128_p7, %p122_p4 }
  0x32   :  { %132 = shalt.err (!%p129_p8)
}
  0x33   :  { %s133_s13 = scalar_lea.hbm %s219_s2, 512 }
  0x34   :  { %p134_p9 = scmp.ne.s32.totalorder %s219_s2, %s133_s13  ;;  %p137_p10 = scmp.lt.u32.totalorder %s133_s13, %s219_s2 }
  0x36   :  { %p139_p11 = pnand %p137_p10, %p134_p9 }
  0x38   :  { %142 = shalt.err (!%p139_p11)
}
  0x39   :  { %65 = dma.vmem_to_hbm [thread:$0]  %s60_s10, 512, %s219_s2, [#allocation4], %s150_s19, %s150_s19, %s151_s20  }
  0x3a   :  { %147 = dma.done.wait [#allocation4], 512  }
  0x3b   :  { %148 = vsyncadd [#allocation4], 4294966784 }
  0x3c   :  { %69 = vsyncpa [#allocation3], 1 }
  0x3d   :  { %70 = vsyncpa [#allocation6], 1 }
  0x3e   :  { %71 = vsyncpa [#allocation4], 1 }

</bundles_post_ra>
